<compile_context>
chip_gen: v7x
topology: tpu7x:2x2x1
jax: 0.10.0
libtpu: 0.0.40
codegen_flags: <defaults>
</compile_context>

<pallas_src>
import functools
import math

import jax
import jax.numpy as jnp
from jax.experimental import pallas as pl
from jax.experimental.pallas import tpu as pltpu


LANES = 128    # lane width / padded output width
HIDDEN = 512   # fixed by the module


def _round_up(x, m):
    return ((x + m - 1) // m) * m


# ---------------------------------------------------------------------------
# Fused predNet kernel (one M tile per grid step, full-K contraction inside)
# ---------------------------------------------------------------------------
def _prednet_kernel(seed_ref, x_ref, w1_ref, b1_ref, w2_ref, b2_ref, out_ref,
                    *, p_drop, train, compute_dtype):
    """out = dropout(relu(x @ W1^T + b1)) @ W2_pad + b2_pad for one M tile.

    seed_ref : (1,)        int32  scalar-prefetch (SMEM) dropout seed
    x_ref    : (tm, Kp)    native dtype (cast to bf16 here, right before MXU)
    w1_ref   : (Kp, H)     bf16   W1 transposed, VMEM-resident
    b1_ref   : (1, H)      f32
    w2_ref   : (H, LANES)  bf16   W2 transposed, zero-padded to 128 lanes
    b2_ref   : (1, LANES)  f32    zero-padded
    out_ref  : (tm, LANES) f32
    """
    # first matmul: full-K contraction against the resident W1^T, f32 acc
    x = x_ref[...].astype(compute_dtype)
    h = jnp.dot(x, w1_ref[...], preferred_element_type=jnp.float32)
    h = jnp.maximum(h + b1_ref[...], jnp.float32(0.0))

    if train and p_drop > 0.0:
        if p_drop >= 1.0:
            # torch Dropout(p=1) zeroes everything
            h = jnp.zeros_like(h)
        else:
            # inverted dropout with the hardware PRNG; the stream is keyed on
            # (user seed, M-tile id) so tiles / consecutive seeds don't alias.
            pltpu.prng_seed(seed_ref[0], pl.program_id(0))
            bits = pltpu.bitcast(pltpu.prng_random_bits(h.shape), jnp.uint32)
            threshold = min(int(p_drop * (2 ** 32)), 2 ** 32 - 1)
            keep = bits >= jnp.uint32(threshold)          # P(keep) = 1 - p
            h = jnp.where(keep, h * jnp.float32(1.0 / (1.0 - p_drop)),
                          jnp.float32(0.0))

    # lane-padded (512 x 128) second matmul -> unmasked 128-wide stores
    y = jnp.dot(h.astype(compute_dtype), w2_ref[...],
                preferred_element_type=jnp.float32) + b2_ref[...]
    out_ref[...] = y.astype(out_ref.dtype)


# ---------------------------------------------------------------------------
# One-time weight preparation (hoisted out of the per-call path)
# ---------------------------------------------------------------------------
def prednet_prepare_params(w1, b1, w2, b2, *, compute_dtype=jnp.bfloat16):
    """Pre-transpose / cast / lane-pad the torch-layout weights once.

    w1 : (512, input_dim)  b1 : (512,)  w2 : (1, 512)  b2 : (1,)
    """
    H, K = w1.shape
    assert H == HIDDEN and b1.shape == (H,)
    assert w2.shape == (1, H) and b2.shape == (1,)
    Kp = _round_up(K, LANES)

    w1_t = jnp.zeros((Kp, H), compute_dtype).at[:K, :].set(
        jnp.asarray(w1, jnp.float32).T.astype(compute_dtype))
    b1_r = jnp.asarray(b1, jnp.float32).reshape(1, H)
    w2_p = jnp.zeros((H, LANES), compute_dtype).at[:, :1].set(
        jnp.asarray(w2, jnp.float32).T.astype(compute_dtype))
    b2_p = jnp.zeros((1, LANES), jnp.float32).at[:, :1].set(
        jnp.asarray(b2, jnp.float32).reshape(1, 1))
    return {"w1_t": w1_t, "b1": b1_r, "w2_p": w2_p, "b2_p": b2_p,
            "input_dim": K}


def _vmem_estimate_bytes(tm, Kp, H, x_itemsize, cd_itemsize):
    w1_res = Kp * H * cd_itemsize * 2             # resident W1^T (conservative x2)
    x_tile = tm * Kp * x_itemsize * 2             # double-buffered x block
    out_t = tm * LANES * 4 * 2                    # double-buffered f32 output
    tmp = tm * H * 4 + tm * Kp * cd_itemsize      # hidden f32 + in-kernel x cast
    small = 2 * (H * 4 + H * LANES * cd_itemsize + LANES * 4)
    return w1_res + x_tile + out_t + tmp + small


# ---------------------------------------------------------------------------
# Forward wrapper
# ---------------------------------------------------------------------------
def prednet_forward(x, params, *, p_drop=0.5, train=False, seed=0,
                    tm=512, compute_dtype=jnp.bfloat16,
                    vmem_limit_bytes=48 * 1024 * 1024):
    """predNet.forward.  x: (B, input_dim) -> (B, 1) float32."""
    w1_t, b1_r = params["w1_t"], params["b1"]
    w2_p, b2_p = params["w2_p"], params["b2_p"]
    B, K = x.shape
    Kp, H = w1_t.shape
    assert K == params["input_dim"], "x feature dim does not match params"
    assert H == HIDDEN and H % LANES == 0
    if train:
        assert 0.0 <= p_drop <= 1.0

    # ---- M-tile selection ------------------------------------------------
    Mp16 = _round_up(B, 16)                 # bf16 sublane packing -> mult of 16
    tm = max(16, min(_round_up(tm, 16), Mp16))
    # keep >= 2 M tiles when one enlarged tile would cover the whole batch,
    # so v7x's two TensorCores both get work.
    if tm == Mp16 and Mp16 >= 256:
        tm = _round_up((Mp16 + 1) // 2, 16)
    # shrink tm until the per-step working set fits comfortably in scoped VMEM
    x_isz = jnp.dtype(x.dtype).itemsize
    cd_isz = jnp.dtype(compute_dtype).itemsize
    budget = int(0.8 * vmem_limit_bytes)
    while tm > 16 and _vmem_estimate_bytes(tm, Kp, H, x_isz, cd_isz) > budget:
        tm = max(16, _round_up(tm // 2, 16))
    # TODO(synk): if input_dim ever grows so large that a VMEM-resident W1^T
    #             cannot fit even at tm=16, reintroduce a K-tiled reduction grid
    #             (with pl.Buffered(3) on x/W1 and tk >= 2048).

    Mp = _round_up(B, tm)
    grid = (Mp // tm,)

    # ---- x staging: zero-copy fast path when already tile-aligned ---------
    if Mp == B and Kp == K:
        x_p = x                                            # no wrapper copy
    else:
        x_p = jnp.zeros((Mp, Kp), x.dtype).at[:B, :K].set(x)

    seed_arr = jnp.asarray([seed], jnp.int32)
    kernel = functools.partial(_prednet_kernel, p_drop=float(p_drop),
                               train=bool(train), compute_dtype=compute_dtype)

    out = pl.pallas_call(
        kernel,
        out_shape=jax.ShapeDtypeStruct((Mp, LANES), jnp.float32),
        grid_spec=pltpu.PrefetchScalarGridSpec(
            num_scalar_prefetch=1,
            grid=grid,
            in_specs=[
                pl.BlockSpec((tm, Kp), lambda i, seed: (i, 0)),    # x (M-pipelined)
                pl.BlockSpec((Kp, H), lambda i, seed: (0, 0)),     # W1^T, resident
                pl.BlockSpec((1, H), lambda i, seed: (0, 0)),      # b1
                pl.BlockSpec((H, LANES), lambda i, seed: (0, 0)),  # W2 lane-padded
                pl.BlockSpec((1, LANES), lambda i, seed: (0, 0)),  # b2 lane-padded
            ],
            out_specs=pl.BlockSpec((tm, LANES), lambda i, seed: (i, 0)),
        ),
        compiler_params=pltpu.CompilerParams(
            dimension_semantics=("parallel",),
            vmem_limit_bytes=int(vmem_limit_bytes)),
    )(seed_arr, x_p, w1_t, b1_r, w2_p, b2_p)

    return out[:B, :1]


# ---------------------------------------------------------------------------
# Demo / self-check
# ---------------------------------------------------------------------------
if __name__ == "__main__":
    B = 16
    input_dim = 256     # real model uses 384 / 4096 / 5120
    dropout = 0.5

    root = jax.random.PRNGKey(0)
    k0, k1, k2, k3, k4 = jax.random.split(root, 5)

    x = jax.random.normal(k0, (B, input_dim), jnp.float32)
    bnd1 = 1.0 / math.sqrt(input_dim)
    w1 = jax.random.uniform(k1, (HIDDEN, input_dim), jnp.float32, -bnd1, bnd1)
    b1 = jax.random.uniform(k2, (HIDDEN,), jnp.float32, -bnd1, bnd1)
    bnd2 = 1.0 / math.sqrt(HIDDEN)
    w2 = jax.random.uniform(k3, (1, HIDDEN), jnp.float32, -bnd2, bnd2)
    b2 = jax.random.uniform(k4, (1,), jnp.float32, -bnd2, bnd2)

    # one-time weight prep (transpose / cast / lane-pad)
    params = prednet_prepare_params(w1, b1, w2, b2)

    # --- eval-mode forward (dropout identity, matches torch .eval()) -------
    y = jax.block_until_ready(
        prednet_forward(x, params, p_drop=dropout, train=False))
    assert y.shape == (B, 1)
    y_ref = jnp.maximum(x @ w1.T + b1, 0.0) @ w2.T + b2
    err = float(jnp.max(jnp.abs(y - y_ref)))
    tol = 5e-2 * (1.0 + float(jnp.max(jnp.abs(y_ref))))
    assert err <= tol, f"mismatch vs reference: max|diff|={err} tol={tol}"
    assert bool(jnp.all(jnp.isfinite(y)))

    # --- unaligned shapes exercise the zero-padding path --------------------
    B2, K2 = 7, 200
    x2 = jax.random.normal(jax.random.PRNGKey(1), (B2, K2), jnp.float32)
    bnd = 1.0 / math.sqrt(K2)
    w1b = jax.random.uniform(jax.random.PRNGKey(2), (HIDDEN, K2), jnp.float32,
                             -bnd, bnd)
    params2 = prednet_prepare_params(w1b, b1, w2, b2)
    y2 = jax.block_until_ready(
        prednet_forward(x2, params2, p_drop=dropout, train=False))
    y2_ref = jnp.maximum(x2 @ w1b.T + b1, 0.0) @ w2.T + b2
    err2 = float(jnp.max(jnp.abs(y2 - y2_ref)))
    tol2 = 5e-2 * (1.0 + float(jnp.max(jnp.abs(y2_ref))))
    assert err2 <= tol2, f"padded-path mismatch: {err2} > {tol2}"
    assert bool(jnp.all(jnp.isfinite(y2)))

    # --- training-mode forward (in-kernel inverted dropout) -----------------
    # The dropout mask uses the Mosaic-only hardware PRNG, so exercise it only
    # on a real TPU backend (skipped under CPU/interpret fallback).
    if jax.devices()[0].platform == "tpu":
        y_tr = jax.block_until_ready(
            prednet_forward(x, params, p_drop=dropout, train=True, seed=123))
        assert y_tr.shape == (B, 1) and bool(jnp.all(jnp.isfinite(y_tr)))
    # TODO(synk): training-mode dropout uses the TPU PRNG, so its mask is not
    #             bit-identical to torch's RNG stream (statistics match).

    print("KERNEL_OK")
</pallas_src>

<mosaic_0001>
module attributes {stable_mosaic.version = 11 : i64} {
  func.func @_prednet_kernel(%arg0: i32, %arg1: memref<1xi32, #tpu.memory_space<smem>>, %arg2: memref<16x256xf32, #tpu.memory_space<vmem>>, %arg3: memref<256x512xbf16, #tpu.memory_space<vmem>>, %arg4: memref<1x512xf32, #tpu.memory_space<vmem>>, %arg5: memref<512x128xbf16, #tpu.memory_space<vmem>>, %arg6: memref<1x128xf32, #tpu.memory_space<vmem>>, %arg7: memref<16x128xf32, #tpu.memory_space<vmem>>) attributes {dimension_semantics = [#tpu.dimension_semantics<parallel>], iteration_bounds = array<i64: 1>, scalar_prefetch = 1 : i64, scratch_operands = 0 : i64, tpu.core_type = #tpu.core_type<tc>, window_params = [{transform_indices = @transform_0, window_bounds = array<i64: 16, 256>}, {pipeline_mode = #tpu.pipeline_mode<synchronous>, transform_indices = @transform_1, window_bounds = array<i64: 256, 512>}, {pipeline_mode = #tpu.pipeline_mode<synchronous>, transform_indices = @transform_2, window_bounds = array<i64: 1, 512>}, {pipeline_mode = #tpu.pipeline_mode<synchronous>, transform_indices = @transform_3, window_bounds = array<i64: 512, 128>}, {pipeline_mode = #tpu.pipeline_mode<synchronous>, transform_indices = @transform_4, window_bounds = array<i64: 1, 128>}, {transform_indices = @transform_5, window_bounds = array<i64: 16, 128>}]} {
    %c0 = arith.constant 0 : index
    %c0_0 = arith.constant 0 : index
    %0 = vector.load %arg2[%c0, %c0_0] : memref<16x256xf32, #tpu.memory_space<vmem>>, vector<16x256xf32>
    %1 = arith.truncf %0 : vector<16x256xf32> to vector<16x256xbf16>
    %c0_1 = arith.constant 0 : index
    %c0_2 = arith.constant 0 : index
    %2 = vector.load %arg3[%c0_1, %c0_2] : memref<256x512xbf16, #tpu.memory_space<vmem>>, vector<256x512xbf16>
    %cst = arith.constant dense<0.000000e+00> : vector<16x512xf32>
    %3 = tpu.matmul %1, %2, %cst {dimension_numbers = #tpu.dot_dimension_numbers<[1], [0], [0], [1], [0, 0, 1, 1], [], []>} : vector<16x256xbf16>, vector<256x512xbf16>, vector<16x512xf32> -> vector<16x512xf32>
    %c0_3 = arith.constant 0 : index
    %c0_4 = arith.constant 0 : index
    %4 = vector.load %arg4[%c0_3, %c0_4] : memref<1x512xf32, #tpu.memory_space<vmem>>, vector<1x512xf32>
    %5 = vector.broadcast %4 : vector<1x512xf32> to vector<16x512xf32>
    %6 = arith.addf %3, %5 : vector<16x512xf32>
    %cst_5 = arith.constant 0.000000e+00 : f32
    %7 = vector.broadcast %cst_5 : f32 to vector<16x512xf32>
    %8 = arith.maximumf %6, %7 : vector<16x512xf32>
    %9 = arith.truncf %8 : vector<16x512xf32> to vector<16x512xbf16>
    %c0_6 = arith.constant 0 : index
    %c0_7 = arith.constant 0 : index
    %10 = vector.load %arg5[%c0_6, %c0_7] : memref<512x128xbf16, #tpu.memory_space<vmem>>, vector<512x128xbf16>
    %cst_8 = arith.constant dense<0.000000e+00> : vector<16x128xf32>
    %11 = tpu.matmul %9, %10, %cst_8 {dimension_numbers = #tpu.dot_dimension_numbers<[1], [0], [0], [1], [0, 0, 1, 1], [], []>} : vector<16x512xbf16>, vector<512x128xbf16>, vector<16x128xf32> -> vector<16x128xf32>
    %c0_9 = arith.constant 0 : index
    %c0_10 = arith.constant 0 : index
    %12 = vector.load %arg6[%c0_9, %c0_10] : memref<1x128xf32, #tpu.memory_space<vmem>>, vector<1x128xf32>
    %13 = vector.broadcast %12 : vector<1x128xf32> to vector<16x128xf32>
    %14 = arith.addf %11, %13 : vector<16x128xf32>
    %c0_11 = arith.constant 0 : index
    %c0_12 = arith.constant 0 : index
    %15 = vector.load %arg7[%c0_11, %c0_12] : memref<16x128xf32, #tpu.memory_space<vmem>>, vector<16x128xf32>
    tpu.vector_store %arg7[%c0_11, %c0_12], %14 {strides = array<i32>} : memref<16x128xf32, #tpu.memory_space<vmem>>, vector<16x128xf32>,
    return
  }
  func.func @transform_0(%arg0: i32, %arg1: memref<1xi32, #tpu.memory_space<smem>>) -> (i32, i32) {
    %c0_i32 = arith.constant 0 : i32
    %c0_i32_0 = arith.constant 0 : i32
    return %arg0, %c0_i32 : i32, i32
  }
  func.func @transform_1(%arg0: i32, %arg1: memref<1xi32, #tpu.memory_space<smem>>) -> (i32, i32) {
    %c0_i32 = arith.constant 0 : i32
    %c0_i32_0 = arith.constant 0 : i32
    %c0_i32_1 = arith.constant 0 : i32
    return %c0_i32, %c0_i32_0 : i32, i32
  }
  func.func @transform_2(%arg0: i32, %arg1: memref<1xi32, #tpu.memory_space<smem>>) -> (i32, i32) {
    %c0_i32 = arith.constant 0 : i32
    %c0_i32_0 = arith.constant 0 : i32
    %c0_i32_1 = arith.constant 0 : i32
    return %c0_i32, %c0_i32_0 : i32, i32
  }
  func.func @transform_3(%arg0: i32, %arg1: memref<1xi32, #tpu.memory_space<smem>>) -> (i32, i32) {
    %c0_i32 = arith.constant 0 : i32
    %c0_i32_0 = arith.constant 0 : i32
    %c0_i32_1 = arith.constant 0 : i32
    return %c0_i32, %c0_i32_0 : i32, i32
  }
  func.func @transform_4(%arg0: i32, %arg1: memref<1xi32, #tpu.memory_space<smem>>) -> (i32, i32) {
    %c0_i32 = arith.constant 0 : i32
    %c0_i32_0 = arith.constant 0 : i32
    %c0_i32_1 = arith.constant 0 : i32
    return %c0_i32, %c0_i32_0 : i32, i32
  }
  func.func @transform_5(%arg0: i32, %arg1: memref<1xi32, #tpu.memory_space<smem>>) -> (i32, i32) {
    %c0_i32 = arith.constant 0 : i32
    %c0_i32_0 = arith.constant 0 : i32
    return %arg0, %c0_i32 : i32, i32
  }
}

</mosaic_0001>

<bundles_post_ra>
// kernel: tpu_custom_call.1
= control target key start
LH: loop header
LB: loop body
LE: loop exit
PB: predicated region body
PF: predicated region fallthrough
CT: control target
= control target key end

     0   :  { %12 = vsyncpa [#allocation5], 0  ;;  %s1419_s0 = inlined_call_operand.<no memory space> [shape: s32[1], index: 0, kind: input, shape index: {}]   ;;  %s1420_s1 = inlined_call_operand.hbm [shape: f32[16,256], index: 1, kind: input, shape index: {}]   ;;  %s1421_s2 = inlined_call_operand.hbm [shape: bf16[256,512], index: 2, kind: input, shape index: {}]   ;;  %s1422_s3 = inlined_call_operand.vmem [shape: f32[1,512], index: 3, kind: input, shape index: {}]   ;;  %s1423_s4 = inlined_call_operand.hbm [shape: bf16[512,128], index: 4, kind: input, shape index: {}]   ;;  %s1424_s5 = inlined_call_operand.vmem [shape: f32[1,128], index: 5, kind: input, shape index: {}]   ;;  %s1425_s6 = inlined_call_operand.hbm [shape: f32[16,128], index: 6, kind: output, shape index: {}]  }
   0x1   :  { %13 = vsyncpa [#allocation8], 0 }
   0x2   :  { %14 = vsyncpa [#allocation6], 0  ;;  %s1313_s0 = smov [#allocation7]   ;;  %s1314_s22 = smov [#allocation4]  }
   0x3   :  { %s32_s21 = sshll.u32 %s1313_s0, 4  ;;  %s20_s23 = sshll.u32 %s1314_s22, 4  ;;  %s33_s21 = int_to_ptr.vmem [resolvable:$true] %s32_s21  ;;  %s1358_s23 = int_to_ptr.vmem [resolvable:$true] %s20_s23 }
   0x4   :  { %s1219_s26 = scalar_lea.hbm %s1421_s2, 8192 }
   0x5   :  { %p1220_p0 = scmp.ne.s32.totalorder %s1421_s2, %s1219_s26  ;;  %p1223_p1 = scmp.lt.u32.totalorder %s1219_s26, %s1421_s2 }
   0x7   :  { %p1225_p2 = pnand %p1223_p1, %p1220_p0 }
   0x9   :  { %1228 = shalt.err (!%p1225_p2)
}
   0xa   :  { %s1229_s7 = scalar_lea.vmem %s33_s21, 8192  ;;  %p1234_p4 = scmp.lt.s32.totalorder %s33_s21, %s33_s21 }
   0xb   :  { %p1230_p3 = scmp.ne.s32.totalorder %s33_s21, %s1229_s7  ;;  %p1235_p5 = scmp.lt.s32.totalorder %s1229_s7, %s1229_s7 }
   0xd   :  { %p1236_p6 = por %p1235_p5, %p1234_p4 }
   0xf   :  { %p1237_p7 = pnand %p1236_p6, %p1230_p3 }
  0x11   :  { %1240 = shalt.err (!%p1237_p7)
}
  0x12   :  { %s1315_s8 = smov 256   ;;  %s1316_s9 = smov 16  }
  0x13   :  { %38 = dma.hbm_to_vmem [thread:$0]  %s1421_s2, 8192, %s33_s21, [#allocation8], %s1315_s8, %s1315_s8, %s1316_s9  }
  0x14   :  { %s1241_s14 = scalar_lea.hbm %s1420_s1, 512 }
  0x15   :  { %p1242_p8 = scmp.ne.s32.totalorder %s1420_s1, %s1241_s14  ;;  %p1245_p9 = scmp.lt.u32.totalorder %s1241_s14, %s1420_s1 }
  0x17   :  { %p1247_p10 = pnand %p1245_p9, %p1242_p8 }
  0x19   :  { %1250 = shalt.err (!%p1247_p10)
}
  0x1a   :  { %s1251_s19 = scalar_lea.vmem %s1358_s23, 512  ;;  %p1256_p12 = scmp.lt.s32.totalorder %s1358_s23, %s1358_s23 }
  0x1b   :  { %p1252_p11 = scmp.ne.s32.totalorder %s1358_s23, %s1251_s19  ;;  %p1257_p13 = scmp.lt.s32.totalorder %s1251_s19, %s1251_s19 }
  0x1d   :  { %p1258_p0 = por %p1257_p13, %p1256_p12 }
  0x1f   :  { %p1259_p1 = pnand %p1258_p0, %p1252_p11 }
  0x21   :  { %1262 = shalt.err (!%p1259_p1)
}
  0x22   :  { %26 = dma.hbm_to_vmem [thread:$0]  %s1420_s1, 512, %s1358_s23, [#allocation5], %s1315_s8, %s1315_s8, %s1316_s9  }
  0x23   :  { %s1317_s0 = smov [#allocation9]   ;;  %s1263_s25 = scalar_lea.hbm %s1423_s4, 4096 }
  0x24   :  { %s46_s21 = sshll.u32 %s1317_s0, 4  ;;  %p1264_p2 = scmp.ne.s32.totalorder %s1423_s4, %s1263_s25  ;;  %s47_s21 = int_to_ptr.vmem [resolvable:$true] %s46_s21 }
  0x25   :  { %p1267_p3 = scmp.lt.u32.totalorder %s1263_s25, %s1423_s4 }
  0x27   :  { %p1269_p4 = pnand %p1267_p3, %p1264_p2 }
  0x29   :  { %1272 = shalt.err (!%p1269_p4)
}
  0x2a   :  { %s1273_s30 = scalar_lea.vmem %s47_s21, 4096  ;;  %p1278_p6 = scmp.lt.s32.totalorder %s47_s21, %s47_s21 }
  0x2b   :  { %p1274_p5 = scmp.ne.s32.totalorder %s47_s21, %s1273_s30  ;;  %p1279_p7 = scmp.lt.s32.totalorder %s1273_s30, %s1273_s30 }
  0x2d   :  { %p1280_p8 = por %p1279_p7, %p1278_p6 }
  0x2f   :  { %p1281_p9 = pnand %p1280_p8, %p1274_p5 }
  0x31   :  { %1284 = shalt.err (!%p1281_p9)
}
  0x32   :  { %s1318_s1 = smov 64   ;;  %s1319_s23 = smov 4  }
  0x33   :  { %52 = dma.hbm_to_vmem [thread:$0]  %s1423_s4, 4096, %s47_s21, [#allocation8], %s1318_s1, %s1318_s1, %s1319_s23  }
  0x34   :  { %1307 = dma.done.wait [#allocation5], 512  }
  0x35   :  { %1308 = vsyncadd [#allocation5], 4294966784 }
  0x36   :  { %1309 = dma.done.wait [#allocation8], 12288  }
  0x37   :  { %1310 = vsyncadd [#allocation8], 4294955008  ;;  %v1091_v0 = vld [vmem:[#allocation7 + $0x4] ss:$16 sps:$4 sm:$0xff]   ;;  %v1093_v1 = vld [vmem:[#allocation7 + $0xc] ss:$16 sps:$4 sm:$0xff]  }
  0x38   :  { %477 = vmatprep.subr.bf16.mxu0 %v1091_v0  ;;  %v1095_v2 = vld [vmem:[#allocation7] ss:$16 sps:$4 sm:$0xff]   ;;  %v1096_v3 = vld [vmem:[#allocation7 + $0x8] ss:$16 sps:$4 sm:$0xff]   ;;  %520 = vmatprep.subr.bf16.mxu1 %v1093_v1  ;;  %v1097_v4 = vld [vmem:[#allocation7 + $0x24] ss:$16 sps:$4 sm:$0xff]  }
  0x39   :  { %478 = vmatpush1.bf16.msra.mxu0 %v1095_v2  ;;  %521 = vmatpush1.bf16.msra.mxu1 %v1096_v3  ;;  %v1099_v5 = vld [vmem:[#allocation7 + $0x2c] ss:$16 sps:$4 sm:$0xff]   ;;  %v1101_v6 = vld [vmem:[#allocation7 + $0x20] ss:$16 sps:$4 sm:$0xff]   ;;  %v1102_v7 = vld [vmem:[#allocation7 + $0x28] ss:$16 sps:$4 sm:$0xff]  }
  0x3a   :  { %479 = vmatprep.subr.bf16.mxu0 %v1097_v4  ;;  %522 = vmatprep.subr.bf16.mxu1 %v1099_v5  ;;  %v1103_v8 = vld [vmem:[#allocation7 + $0x44] ss:$16 sps:$4 sm:$0xff]   ;;  %v1105_v9 = vld [vmem:[#allocation7 + $0x4c] ss:$16 sps:$4 sm:$0xff]   ;;  %v1107_v10 = vld [vmem:[#allocation7 + $0x40] ss:$16 sps:$4 sm:$0xff]  }
  0x3b   :  { %v1108_v11 = vld [vmem:[#allocation7 + $0x48] ss:$16 sps:$4 sm:$0xff]   ;;  %v1109_v12 = vld [vmem:[#allocation7 + $0x64] ss:$16 sps:$4 sm:$0xff]   ;;  %v1111_v13 = vld [vmem:[#allocation7 + $0x6c] ss:$16 sps:$4 sm:$0xff]  }
  0x3c   :  { %v1113_v14 = vld [vmem:[#allocation7 + $0x60] ss:$16 sps:$4 sm:$0xff]   ;;  %v1114_v15 = vld [vmem:[#allocation7 + $0x68] ss:$16 sps:$4 sm:$0xff]   ;;  %v1115_v16 = vld [vmem:[#allocation7 + $0x84] ss:$16 sps:$4 sm:$0xff]  }
  0x3d   :  { %480 = vmatpush1.bf16.msra.mxu0 %v1101_v6  ;;  %523 = vmatpush1.bf16.msra.mxu1 %v1102_v7  ;;  %v1117_v17 = vld [vmem:[#allocation7 + $0x8c] ss:$16 sps:$4 sm:$0xff]   ;;  %v1119_v18 = vld [vmem:[#allocation7 + $0x80] ss:$16 sps:$4 sm:$0xff]   ;;  %v1120_v19 = vld [vmem:[#allocation7 + $0x88] ss:$16 sps:$4 sm:$0xff]  }
  0x3e   :  { %481 = vmatprep.subr.bf16.mxu0 %v1103_v8  ;;  %524 = vmatprep.subr.bf16.mxu1 %v1105_v9  ;;  %v1121_v20 = vld [vmem:[#allocation7 + $0xa4] ss:$16 sps:$4 sm:$0xff]   ;;  %v1123_v21 = vld [vmem:[#allocation7 + $0xac] ss:$16 sps:$4 sm:$0xff]   ;;  %v1125_v22 = vld [vmem:[#allocation7 + $0xa0] ss:$16 sps:$4 sm:$0xff]  }
  0x3f   :  { %v1126_v23 = vld [vmem:[#allocation7 + $0xa8] ss:$16 sps:$4 sm:$0xff]   ;;  %v1127_v24 = vld [vmem:[#allocation7 + $0xc4] ss:$16 sps:$4 sm:$0xff]   ;;  %v1129_v25 = vld [vmem:[#allocation7 + $0xcc] ss:$16 sps:$4 sm:$0xff]  }
  0x40   :  { %v1131_v26 = vld [vmem:[#allocation7 + $0xc0] ss:$16 sps:$4 sm:$0xff]   ;;  %v1132_v27 = vld [vmem:[#allocation7 + $0xc8] ss:$16 sps:$4 sm:$0xff]   ;;  %v1133_v28 = vld [vmem:[#allocation7 + $0xe4] ss:$16 sps:$4 sm:$0xff]  }
  0x41   :  { %482 = vmatpush1.bf16.msra.mxu0 %v1107_v10  ;;  %525 = vmatpush1.bf16.msra.mxu1 %v1108_v11  ;;  %v1135_v29 = vld [vmem:[#allocation7 + $0xec] ss:$16 sps:$4 sm:$0xff]   ;;  %v1137_v30 = vld [vmem:[#allocation7 + $0xe0] ss:$16 sps:$4 sm:$0xff]   ;;  %v1138_v31 = vld [vmem:[#allocation7 + $0xe8] ss:$16 sps:$4 sm:$0xff]  }
  0x42   :  { %483 = vmatprep.subr.bf16.mxu0 %v1109_v12  ;;  %526 = vmatprep.subr.bf16.mxu1 %v1111_v13  ;;  %v1139_v32 = vld [vmem:[#allocation7 + $0x104] ss:$16 sps:$4 sm:$0xff]   ;;  %v1141_v33 = vld [vmem:[#allocation7 + $0x10c] ss:$16 sps:$4 sm:$0xff]   ;;  %v1143_v34 = vld [vmem:[#allocation7 + $0x100] ss:$16 sps:$4 sm:$0xff]  }
  0x43   :  { %v1144_v35 = vld [vmem:[#allocation7 + $0x108] ss:$16 sps:$4 sm:$0xff]   ;;  %v1145_v36 = vld [vmem:[#allocation7 + $0x124] ss:$16 sps:$4 sm:$0xff]   ;;  %v1147_v37 = vld [vmem:[#allocation7 + $0x12c] ss:$16 sps:$4 sm:$0xff]  }
  0x44   :  { %v1149_v38 = vld [vmem:[#allocation7 + $0x120] ss:$16 sps:$4 sm:$0xff]   ;;  %v1150_v39 = vld [vmem:[#allocation7 + $0x128] ss:$16 sps:$4 sm:$0xff]   ;;  %v1151_v40 = vld [vmem:[#allocation7 + $0x144] ss:$16 sps:$4 sm:$0xff]  }
  0x45   :  { %484 = vmatpush1.bf16.msra.mxu0 %v1113_v14  ;;  %527 = vmatpush1.bf16.msra.mxu1 %v1114_v15  ;;  %v1153_v41 = vld [vmem:[#allocation7 + $0x14c] ss:$16 sps:$4 sm:$0xff]   ;;  %v1155_v42 = vld [vmem:[#allocation7 + $0x140] ss:$16 sps:$4 sm:$0xff]   ;;  %v1156_v43 = vld [vmem:[#allocation7 + $0x148] ss:$16 sps:$4 sm:$0xff]  }
  0x46   :  { %485 = vmatprep.subr.bf16.mxu0 %v1115_v16  ;;  %528 = vmatprep.subr.bf16.mxu1 %v1117_v17  ;;  %v1157_v44 = vld [vmem:[#allocation7 + $0x164] ss:$16 sps:$4 sm:$0xff]   ;;  %v1159_v45 = vld [vmem:[#allocation7 + $0x16c] ss:$16 sps:$4 sm:$0xff]   ;;  %v1161_v47 = vld [vmem:[#allocation7 + $0x160] ss:$16 sps:$4 sm:$0xff]  }
  0x47   :  { %v66_v46 = vld [vmem:[#allocation4 + $0x8] sm:$0xff]  ;;  %v68_v49 = vld [vmem:[#allocation4 + $0x18] sm:$0xff]  ;;  %v1163_v50 = vld [vmem:[#allocation7 + $0x184] ss:$16 sps:$4 sm:$0xff]   ;;  %s1320_s11 = smov [#allocation10]  }
  0x48   :  { %v1162_v48 = vld [vmem:[#allocation7 + $0x168] ss:$16 sps:$4 sm:$0xff]   ;;  %v70_v51 = vpack.c.bf16 %v68_v49, %v66_v46  ;;  %v1165_v52 = vld [vmem:[#allocation7 + $0x18c] ss:$16 sps:$4 sm:$0xff]   ;;  %v1167_v53 = vld [vmem:[#allocation7 + $0x180] ss:$16 sps:$4 sm:$0xff]  }
  0x49   :  { %486 = vmatpush1.bf16.msra.mxu0 %v1119_v18  ;;  %529 = vmatpush1.bf16.msra.mxu1 %v1120_v19  ;;  %v1168_v54 = vld [vmem:[#allocation7 + $0x188] ss:$16 sps:$4 sm:$0xff]   ;;  %v1169_v55 = vld [vmem:[#allocation7 + $0x1a4] ss:$16 sps:$4 sm:$0xff]   ;;  %v1171_v56 = vld [vmem:[#allocation7 + $0x1ac] ss:$16 sps:$4 sm:$0xff]  }
  0x4a   :  { %487 = vmatprep.subr.bf16.mxu0 %v1121_v20  ;;  %530 = vmatprep.subr.bf16.mxu1 %v1123_v21  ;;  %v1173_v57 = vld [vmem:[#allocation7 + $0x1a0] ss:$16 sps:$4 sm:$0xff]   ;;  %v1174_v58 = vld [vmem:[#allocation7 + $0x1a8] ss:$16 sps:$4 sm:$0xff]   ;;  %v1175_v59 = vld [vmem:[#allocation7 + $0x1c4] ss:$16 sps:$4 sm:$0xff]  }
  0x4b   :  { %509 = vmatprep.mubr.bf16.mxu0 %v70_v51  ;;  %552 = vmatprep.mubr.bf16.mxu1 %v70_v51  ;;  %v1177_v60 = vld [vmem:[#allocation7 + $0x1cc] ss:$16 sps:$4 sm:$0xff]   ;;  %v1179_v61 = vld [vmem:[#allocation7 + $0x1c0] ss:$16 sps:$4 sm:$0xff]   ;;  %v1180_v62 = vld [vmem:[#allocation7 + $0x1c8] ss:$16 sps:$4 sm:$0xff]  }
  0x4c   :  { %v1181_v63 = vld [vmem:[#allocation7 + $0x1e4] ss:$16 sps:$4 sm:$0xff]   ;;  %v1183_v0 = vld [vmem:[#allocation7 + $0x1ec] ss:$16 sps:$4 sm:$0xff]   ;;  %v1185_v1 = vld [vmem:[#allocation7 + $0x1e0] ss:$16 sps:$4 sm:$0xff]  }
  0x4d   :  { %488 = vmatpush1.bf16.msra.mxu0 %v1125_v22  ;;  %531 = vmatpush1.bf16.msra.mxu1 %v1126_v23  ;;  %v1186_v2 = vld [vmem:[#allocation7 + $0x1e8] ss:$16 sps:$4 sm:$0xff]   ;;  %v65_v3 = vld [vmem:[#allocation4] sm:$0xff]  ;;  %v67_v4 = vld [vmem:[#allocation4 + $0x10] sm:$0xff]  ;;  %s927_s12 = sshll.u32 %s1320_s11, 4  ;;  %s928_s12 = int_to_ptr.vmem [resolvable:$true] %s927_s12 }
  0x4e   :  { %489 = vmatprep.subr.bf16.mxu0 %v1127_v24  ;;  %532 = vmatprep.subr.bf16.mxu1 %v1129_v25  ;;  %v1187_v5 = vld [vmem:[#allocation9 + $0x40] sm:$0xff]   ;;  %v69_v8 = vpack.c.bf16 %v67_v4, %v65_v3  ;;  %v1191_v10 = vld [vmem:[#allocation9 + $0x48] sm:$0xff]   ;;  %v1195_v14 = vld [vmem:[#allocation9 + $0x50] sm:$0xff]   ;;  %p1290_p11 = scmp.lt.s32.totalorder %s928_s12, %s928_s12 }
  0x4f   :  { %v1188_v6 = vld [vmem:[#allocation9 + $0xc0] sm:$0xff]   ;;  %v1192_v11 = vld [vmem:[#allocation9 + $0xc8] sm:$0xff]   ;;  %v1196_v15 = vld [vmem:[#allocation9 + $0xd0] sm:$0xff]  }
  0x50   :  { %v1189_v7 = vld [vmem:[#allocation9] sm:$0xff]   ;;  %v1193_v12 = vld [vmem:[#allocation9 + $0x8] sm:$0xff]   ;;  %v1197_v16 = vld [vmem:[#allocation9 + $0x10] sm:$0xff]  }
  0x51   :  { %490 = vmatpush1.bf16.msra.mxu0 %v1131_v26  ;;  %533 = vmatpush1.bf16.msra.mxu1 %v1132_v27  ;;  %v1190_v9 = vld [vmem:[#allocation9 + $0x80] sm:$0xff]   ;;  %v1194_v13 = vld [vmem:[#allocation9 + $0x88] sm:$0xff]   ;;  %v1198_v17 = vld [vmem:[#allocation9 + $0x90] sm:$0xff]  }
  0x52   :  { %491 = vmatprep.subr.bf16.mxu0 %v1133_v28  ;;  %534 = vmatprep.subr.bf16.mxu1 %v1135_v29  ;;  %v1199_v18 = vld [vmem:[#allocation9 + $0x58] sm:$0xff]   ;;  %v1203_v22 = vld [vmem:[#allocation9 + $0x60] sm:$0xff]   ;;  %v1207_v26 = vld [vmem:[#allocation9 + $0x68] sm:$0xff]  }
  0x53   :  { %v1200_v19 = vld [vmem:[#allocation9 + $0xd8] sm:$0xff]   ;;  %v1204_v23 = vld [vmem:[#allocation9 + $0xe0] sm:$0xff]   ;;  %v1208_v27 = vld [vmem:[#allocation9 + $0xe8] sm:$0xff]  }
  0x54   :  { %v1201_v20 = vld [vmem:[#allocation9 + $0x18] sm:$0xff]   ;;  %v1205_v24 = vld [vmem:[#allocation9 + $0x20] sm:$0xff]   ;;  %v1209_v28 = vld [vmem:[#allocation9 + $0x28] sm:$0xff]  }
  0x55   :  { %492 = vmatpush1.bf16.msra.mxu0 %v1137_v30  ;;  %535 = vmatpush1.bf16.msra.mxu1 %v1138_v31  ;;  %v1202_v21 = vld [vmem:[#allocation9 + $0x98] sm:$0xff]   ;;  %v1206_v25 = vld [vmem:[#allocation9 + $0xa0] sm:$0xff]   ;;  %v1210_v29 = vld [vmem:[#allocation9 + $0xa8] sm:$0xff]  }
  0x56   :  { %493 = vmatprep.subr.bf16.mxu0 %v1139_v32  ;;  %536 = vmatprep.subr.bf16.mxu1 %v1141_v33  ;;  %v1211_v30 = vld [vmem:[#allocation9 + $0x70] sm:$0xff]  }
  0x57   :  { %v1212_v31 = vld [vmem:[#allocation9 + $0xf0] sm:$0xff]  }
  0x58   :  { %v1213_v32 = vld [vmem:[#allocation9 + $0x30] sm:$0xff]  }
  0x59   :  { %494 = vmatpush1.bf16.msra.mxu0 %v1143_v34  ;;  %537 = vmatpush1.bf16.msra.mxu1 %v1144_v35  ;;  %v1214_v33 = vld [vmem:[#allocation9 + $0xb0] sm:$0xff]   ;;  %v1215_v34 = vld [vmem:[#allocation9 + $0x78] sm:$0xff]  }
  0x5a   :  { %495 = vmatprep.subr.bf16.mxu0 %v1145_v36  ;;  %538 = vmatprep.subr.bf16.mxu1 %v1147_v37  ;;  %v1216_v35 = vld [vmem:[#allocation9 + $0xf8] sm:$0xff]  }
  0x5b   :  { %v1217_v36 = vld [vmem:[#allocation9 + $0x38] sm:$0xff]  }
  0x5c   :  { %v1218_v37 = vld [vmem:[#allocation9 + $0xb8] sm:$0xff]  }
  0x5d   :  { %496 = vmatpush1.bf16.msra.mxu0 %v1149_v38  ;;  %539 = vmatpush1.bf16.msra.mxu1 %v1150_v39  ;;  %v137_v38 = vlaneseq }
  0x5e   :  { %497 = vmatprep.subr.bf16.mxu0 %v1151_v40  ;;  %540 = vmatprep.subr.bf16.mxu1 %v1153_v41 }
  0x5f   :  { %v138_v39 = vshrl.u32 %v137_v38, 7 }
  0x61   :  { %498 = vmatpush1.bf16.msra.mxu0 %v1155_v42  ;;  %541 = vmatpush1.bf16.msra.mxu1 %v1156_v43  ;;  %v139_v40 = vsub.s32 0, %v138_v39  ;;  %v147_v41 = vsub.s32 2, %v138_v39  ;;  %v135_v42 = vld [vmem:[%s1422_s3] sm:$0xf]  ;;  %v143_v43 = vsub.s32 1, %v138_v39 }
  0x62   :  { %499 = vmatprep.subr.bf16.mxu0 %v1157_v44  ;;  %542 = vmatprep.subr.bf16.mxu1 %v1159_v45  ;;  %v151_v44 = vsub.s32 3, %v138_v39 }
  0x63   :  { %v140_v45 = vrot.slane %v135_v42, %v139_v40  ;;  %v148_v46 = vrot.slane %v135_v42, %v147_v41 }
  0x65   :  { %500 = vmatpush1.bf16.msra.mxu0 %v1161_v47  ;;  %543 = vmatpush1.bf16.msra.mxu1 %v1162_v48  ;;  %v144_v47 = vrot.slane %v135_v42, %v143_v43  ;;  %v152_v48 = vrot.slane %v135_v42, %v151_v44 }
  0x66   :  { %501 = vmatprep.subr.bf16.mxu0 %v1163_v50  ;;  %544 = vmatprep.subr.bf16.mxu1 %v1165_v52 }
  0x69   :  { %502 = vmatpush1.bf16.msra.mxu0 %v1167_v53  ;;  %545 = vmatpush1.bf16.msra.mxu1 %v1168_v54 }
  0x6a   :  { %503 = vmatprep.subr.bf16.mxu0 %v1169_v55  ;;  %546 = vmatprep.subr.bf16.mxu1 %v1171_v56 }
  0x6d   :  { %504 = vmatpush1.bf16.msra.mxu0 %v1173_v57  ;;  %547 = vmatpush1.bf16.msra.mxu1 %v1174_v58 }
  0x6e   :  { %505 = vmatprep.subr.bf16.mxu0 %v1175_v59  ;;  %548 = vmatprep.subr.bf16.mxu1 %v1177_v60 }
  0x71   :  { %506 = vmatpush1.bf16.msra.mxu0 %v1179_v61  ;;  %549 = vmatpush1.bf16.msra.mxu1 %v1180_v62 }
  0x72   :  { %507 = vmatprep.subr.bf16.mxu0 %v1181_v63  ;;  %550 = vmatprep.subr.bf16.mxu1 %v1183_v0 }
  0x75   :  { %508 = vmatpush1.bf16.msra.mxu0 %v1185_v1  ;;  %551 = vmatpush1.bf16.msra.mxu1 %v1186_v2 }
  0x76   :  { %1037 = vmatprep.subr.bf16.mxu0 %v1187_v5  ;;  %1059 = vmatprep.subr.bf16.mxu1 %v1188_v6 }
  0x78   :  { %510 = vmatmul.mubr.bf16.vlgmr.msra.gmra.mrb[0].mxu0 %v69_v8  ;;  %553 = vmatmul.mubr.bf16.vlgmr.msra.gmra.mrb[0].mxu1 %v69_v8 }
  0x79   :  { %1038 = vmatpush3.bf16.msra.mxu0 %v1189_v7  ;;  %1060 = vmatpush3.bf16.msra.mxu1 %v1190_v9 }
  0x7a   :  { %1039 = vmatprep.subr.bf16.mxu0 %v1191_v10  ;;  %1061 = vmatprep.subr.bf16.mxu1 %v1192_v11 }
  0x7d   :  { %1040 = vmatpush3.bf16.msra.mxu0 %v1193_v12  ;;  %1062 = vmatpush3.bf16.msra.mxu1 %v1194_v13 }
  0x7e   :  { %1041 = vmatprep.subr.bf16.mxu0 %v1195_v14  ;;  %1063 = vmatprep.subr.bf16.mxu1 %v1196_v15  ;;  %v1004_v15 = vld [vmem:[%s1424_s5] ss:$0 sm:$0xff]  ;;  %s1285_s5 = scalar_lea.vmem %s928_s12, 256 }
  0x7f   :  { %p1286_p10 = scmp.ne.s32.totalorder %s928_s12, %s1285_s5  ;;  %p1291_p12 = scmp.lt.s32.totalorder %s1285_s5, %s1285_s5 }
  0x81   :  { %1042 = vmatpush3.bf16.msra.mxu0 %v1197_v16  ;;  %1064 = vmatpush3.bf16.msra.mxu1 %v1198_v17  ;;  %p1292_p13 = por %p1291_p12, %p1290_p11 }
  0x82   :  { %1043 = vmatprep.subr.bf16.mxu0 %v1199_v18  ;;  %1065 = vmatprep.subr.bf16.mxu1 %v1200_v19 }
  0x83   :  { %p1293_p0 = pnand %p1292_p13, %p1286_p10 }
  0x85   :  { %1044 = vmatpush3.bf16.msra.mxu0 %v1201_v20  ;;  %1066 = vmatpush3.bf16.msra.mxu1 %v1202_v21 }
  0x86   :  { %1045 = vmatprep.subr.bf16.mxu0 %v1203_v22  ;;  %1067 = vmatprep.subr.bf16.mxu1 %v1204_v23 }
  0x89   :  { %1046 = vmatpush3.bf16.msra.mxu0 %v1205_v24  ;;  %1068 = vmatpush3.bf16.msra.mxu1 %v1206_v25 }
  0x8a   :  { %1047 = vmatprep.subr.bf16.mxu0 %v1207_v26  ;;  %1069 = vmatprep.subr.bf16.mxu1 %v1208_v27 }
  0x8d   :  { %1048 = vmatpush3.bf16.msra.mxu0 %v1209_v28  ;;  %1070 = vmatpush3.bf16.msra.mxu1 %v1210_v29 }
  0x8e   :  { %1049 = vmatprep.subr.bf16.mxu0 %v1211_v30  ;;  %1071 = vmatprep.subr.bf16.mxu1 %v1212_v31 }
  0x91   :  { %1050 = vmatpush3.bf16.msra.mxu0 %v1213_v32  ;;  %1072 = vmatpush3.bf16.msra.mxu1 %v1214_v33 }
  0x92   :  { %1051 = vmatprep.subr.bf16.mxu0 %v1215_v34  ;;  %1073 = vmatprep.subr.bf16.mxu1 %v1216_v35 }
  0x95   :  { %1052 = vmatpush3.bf16.msra.mxu0 %v1217_v36  ;;  %1074 = vmatpush3.bf16.msra.mxu1 %v1218_v37 }
 0x14b   :  { %v511_v49 = vpop.f32.mrb[0].mxu0  ;;  %v554_v50 = vpop.f32.mrb[0].mxu1 }
 0x14c   :  { %v512_v51 = vadd.f32 %v511_v49, %v140_v45  ;;  %v555_v52 = vadd.f32 %v554_v50, %v148_v46  ;;  %v513_v53 = vpop.f32.mrb[1].mxu0  ;;  %v556_v54 = vpop.f32.mrb[1].mxu1 }
 0x14d   :  { %v514_v55 = vadd.f32 %v513_v53, %v144_v47  ;;  %v557_v56 = vadd.f32 %v556_v54, %v152_v48  ;;  %v515_v57 = vpop.f32.mrb[2].mxu0  ;;  %v558_v58 = vpop.f32.mrb[2].mxu1 }
 0x14e   :  { %v565_v59 = vmax.f32 %v555_v52, 0.0  ;;  %v516_v60 = vadd.f32 %v515_v57, %v140_v45  ;;  %v559_v61 = vadd.f32 %v558_v58, %v148_v46  ;;  %v517_v62 = vpop.f32.mrb[3].mxu0  ;;  %v560_v63 = vpop.f32.mrb[3].mxu1  ;;  %v563_v3 = vmax.f32 %v512_v51, 0.0 }
 0x14f   :  { %v566_v0 = vmax.f32 %v557_v56, 0.0  ;;  %v518_v1 = vadd.f32 %v517_v62, %v144_v47  ;;  %v561_v2 = vadd.f32 %v560_v63, %v152_v48  ;;  %v564_v6 = vmax.f32 %v514_v55, 0.0 }
 0x150   :  { %v567_v4 = vmax.f32 %v516_v60, 0.0  ;;  %v569_v5 = vmax.f32 %v559_v61, 0.0 }
 0x151   :  { %v568_v7 = vmax.f32 %v518_v1, 0.0  ;;  %v570_v8 = vmax.f32 %v561_v2, 0.0 }
 0x152   :  { %v571_v9 = vpack.c.bf16 %v567_v4, %v563_v3  ;;  %v573_v10 = vpack.c.bf16 %v569_v5, %v565_v59 }
 0x153   :  { %v572_v11 = vpack.c.bf16 %v568_v7, %v564_v6  ;;  %v574_v12 = vpack.c.bf16 %v570_v8, %v566_v0 }
 0x155   :  { %870 = vmatprep.mubr.bf16.mxu0 %v572_v11  ;;  %911 = vmatprep.mubr.bf16.mxu1 %v574_v12 }
 0x156   :  { %871 = vmatmul.mubr.bf16.vlgmr.msra.gmra.mrb[4].mxu0 %v571_v9  ;;  %912 = vmatmul.mubr.bf16.vlgmr.msra.gmra.mrb[4].mxu1 %v573_v10 }
 0x229   :  { %v1053_v13 = vpop.f32.mrb[4].mxu0  ;;  %v1075_v14 = vpop.f32.mrb[4].mxu1 }
 0x22a   :  { %v1054_v16 = vpop.f32.mrb[5].mxu0  ;;  %v1076_v17 = vpop.f32.mrb[5].mxu1 }
 0x22b   :  { %v1055_v18 = vadd.f32 %v1054_v16, %v1053_v13  ;;  %v1077_v19 = vadd.f32 %v1076_v17, %v1075_v14  ;;  %v1056_v20 = vpop.f32.mrb[6].mxu0  ;;  %v1078_v21 = vpop.f32.mrb[6].mxu1 }
 0x22c   :  { %v1057_v22 = vpop.f32.mrb[7].mxu0  ;;  %v1079_v23 = vpop.f32.mrb[7].mxu1 }
 0x22d   :  { %v873_v24 = vadd.f32 %v1055_v18, %v1004_v15  ;;  %v1058_v25 = vadd.f32 %v1057_v22, %v1056_v20  ;;  %v1080_v26 = vadd.f32 %v1079_v23, %v1078_v21 }
 0x22f   :  { %v914_v27 = vadd.f32 %v1077_v19, %v873_v24  ;;  %v876_v28 = vadd.f32 %v1058_v25, %v1004_v15 }
 0x231   :  { %920 = vst [vmem:[#allocation10] sm:$0xff] %v914_v27  ;;  %v917_v29 = vadd.f32 %v1080_v26, %v876_v28 }
 0x233   :  { %921 = vst [vmem:[#allocation10 + $0x8] sm:$0xff] %v917_v29 }
 0x234   :  { %1296 = shalt.err (!%p1293_p0)
}
 0x235   :  { %s1297_s15 = scalar_lea.hbm %s1425_s6, 256 }
 0x236   :  { %p1298_p1 = scmp.ne.s32.totalorder %s1425_s6, %s1297_s15  ;;  %p1301_p2 = scmp.lt.u32.totalorder %s1297_s15, %s1425_s6 }
 0x238   :  { %p1303_p3 = pnand %p1301_p2, %p1298_p1 }
 0x23a   :  { %1306 = shalt.err (!%p1303_p3)
}
 0x23b   :  { %s1321_s2 = smov 128   ;;  %s1322_s20 = smov 8  }
 0x23c   :  { %933 = dma.vmem_to_hbm [thread:$0]  %s928_s12, 256, %s1425_s6, [#allocation6], %s1321_s2, %s1321_s2, %s1322_s20  }
 0x23d   :  { %1311 = dma.done.wait [#allocation6], 256  }
 0x23e   :  { %1312 = vsyncadd [#allocation6], 4294967040 }
 0x23f   :  { %937 = vsyncpa [#allocation5], 1 }
 0x240   :  { %938 = vsyncpa [#allocation8], 1 }
 0x241   :  { %939 = vsyncpa [#allocation6], 1 }

</bundles_post_ra>
